<compile_context>
chip_gen: v5e
topology: v5e:2x2
jax: 0.10.0
libtpu: 0.0.40
codegen_flags: <defaults>
</compile_context>

<pallas_src>
import jax
import jax.numpy as jnp
from jax.experimental import pallas as pl
from jax.experimental.pallas import tpu as pltpu

DATASET_CLASSES = 527    # backbone output dimension (AudioSet classes)
OUTPUT_CLASSES = 5       # Net() head output dimension
C_OUT_PAD = 128          # lane-dense padded output width (do NOT widen to 256)
MAX_BLOCK_B = 4096       # batch tile cap (~10.5 MiB double-buffered VMEM)


def _round_up(x, m):
    return ((x + m - 1) // m) * m


def _fc_sigmoid_kernel(x_ref, w_ref, b_ref, o_ref):
    """out = sigmoid(x @ w + b) for one batch tile; w/b stay resident.

    bf16 x bf16 -> f32 on the MXU, f32 bias add + sigmoid (EUP), bf16 store.
    """
    z = jnp.dot(x_ref[...], w_ref[...], preferred_element_type=jnp.float32)
    o_ref[...] = jax.nn.sigmoid(z + b_ref[...]).astype(o_ref.dtype)


def prepare_head_params(weight_t, bias):
    """One-time layout prep: pad N 5->128 (lane-dense), weight in bf16."""
    c_in, c_out = weight_t.shape
    w_pad = jnp.zeros((c_in, C_OUT_PAD), dtype=jnp.bfloat16)
    w_pad = w_pad.at[:, :c_out].set(weight_t.astype(jnp.bfloat16))
    b_pad = jnp.zeros((1, C_OUT_PAD), dtype=jnp.float32)
    b_pad = b_pad.at[0, :c_out].set(bias.astype(jnp.float32))
    # TODO(synk): if the backbone can emit preds with K padded to a lane
    # multiple (and fp8 on v7x), pad K here too; never pad preds per-call.
    return w_pad, b_pad


def _choose_block_b(B, cap=MAX_BLOCK_B):
    """Batch tile: multiple of 8 (sublane rule), 16 preferred for packed bf16,
    >= 2 tiles whenever B > 16 so both v7x TensorCores get work, capped for
    VMEM."""
    if B <= 16:
        return _round_up(max(B, 1), 8)
    return min(cap, _round_up(pl.cdiv(B, 2), 16))


def net_head(preds, w_pad, b_pad, *, block_b=None):
    """preds [B, C_in] (native dtype, e.g. bf16) -> sigmoid(Linear) [B, 5] f32."""
    B, C_in = preds.shape
    c_out_pad = w_pad.shape[1]

    TB = _choose_block_b(B) if block_b is None else block_b
    num_tiles = pl.cdiv(B, TB)   # last tile may be partial; rows are independent

    cost = pl.CostEstimate(
        flops=2 * B * C_in * c_out_pad,
        transcendentals=B * c_out_pad,
        bytes_accessed=(preds.size * preds.dtype.itemsize
                        + w_pad.size * w_pad.dtype.itemsize
                        + b_pad.size * b_pad.dtype.itemsize
                        + B * c_out_pad * 2),
    )

    out = pl.pallas_call(
        _fc_sigmoid_kernel,
        out_shape=jax.ShapeDtypeStruct((B, c_out_pad), jnp.bfloat16),
        grid=(num_tiles,),
        in_specs=[
            pl.BlockSpec((TB, C_in), lambda i: (i, 0)),         # preds tile
            pl.BlockSpec((C_in, c_out_pad), lambda i: (0, 0)),   # resident W
            pl.BlockSpec((1, c_out_pad), lambda i: (0, 0)),      # resident b
        ],
        out_specs=pl.BlockSpec((TB, c_out_pad), lambda i: (i, 0)),
        compiler_params=pltpu.CompilerParams(
            dimension_semantics=("parallel",),      # both TCs when num_tiles>=2
            vmem_limit_bytes=32 * 1024 * 1024,      # explicit (v5e default 16MiB)
        ),
        cost_estimate=cost,
    )(preds, w_pad, b_pad)

    # Drop the lane padding of the output; upcast once in the wrapper.
    return out[:, :OUTPUT_CLASSES].astype(jnp.float32)


def _xla_head(preds, w_pad, b_pad):
    """Plain-XLA head for tiny batches (fuses into the backbone epilogue)."""
    z = jnp.dot(preds.astype(jnp.bfloat16), w_pad,
                preferred_element_type=jnp.float32)
    return jax.nn.sigmoid(z + b_pad)[:, :OUTPUT_CLASSES]


def full_network_forward(preds, w_pad, b_pad, *, min_pallas_batch=0):
    """Full_network.forward with the backbone stubbed out (see TODO above).

    `preds` plays the role of `preds = self.model(spec)[0]`; it is consumed in
    its native dtype (the f32-accumulating MXU matmul subsumes `.float()`).
    For production with tiny B, set min_pallas_batch~256 so the head fuses
    into XLA instead of paying a standalone custom-call dispatch.
    """
    if preds.shape[0] < min_pallas_batch:
        return _xla_head(preds, w_pad, b_pad)
    return net_head(preds, w_pad, b_pad)


def init_net_params(key):
    """Deterministic Net() params: xavier_normal_ weight, zero bias."""
    fan_in, fan_out = DATASET_CLASSES, OUTPUT_CLASSES
    std = (2.0 / (fan_in + fan_out)) ** 0.5
    # PyTorch weight is [out, in]; keep its transpose [in, out] for the MXU.
    weight_t = std * jax.random.normal(key, (fan_in, fan_out), dtype=jnp.float32)
    bias = jnp.zeros((fan_out,), dtype=jnp.float32)
    return weight_t, bias


if __name__ == "__main__":
    key = jax.random.PRNGKey(0)
    k_w, k_x = jax.random.split(key)

    weight_t, bias = init_net_params(k_w)
    w_pad, b_pad = prepare_head_params(weight_t, bias)   # one-time layout prep

    # Small batch of backbone logits ("preds" from the frozen MobileNet), bf16.
    # B=24 exercises the multi-tile + partial-last-tile path (TB=16, 2 tiles).
    B = 24
    preds = jax.random.normal(k_x, (B, DATASET_CLASSES)).astype(jnp.bfloat16)

    out = full_network_forward(preds, w_pad, b_pad)
    out = jax.block_until_ready(out)

    # Reference in plain JAX, using the same bf16-rounded operands.
    ref = jax.nn.sigmoid(
        preds.astype(jnp.float32) @ weight_t.astype(jnp.bfloat16).astype(jnp.float32)
        + bias[None, :])

    assert out.shape == (B, OUTPUT_CLASSES)
    # Kernel output is bf16-rounded sigmoid (values in [0,1]) -> atol ~2^-9.
    assert jnp.allclose(out, ref, atol=4e-3, rtol=1e-2)

    print("KERNEL_OK")
</pallas_src>

<mosaic_0001>
module attributes {stable_mosaic.version = 11 : i64} {
  func.func @_fc_sigmoid_kernel(%arg0: i32, %arg1: memref<16x527xbf16, #tpu.memory_space<vmem>>, %arg2: memref<527x128xbf16, #tpu.memory_space<vmem>>, %arg3: memref<1x128xf32, #tpu.memory_space<vmem>>, %arg4: memref<16x128xbf16, #tpu.memory_space<vmem>>) attributes {dimension_semantics = [#tpu.dimension_semantics<parallel>], iteration_bounds = array<i64: 2>, scalar_prefetch = 0 : i64, scratch_operands = 0 : i64, tpu.core_type = #tpu.core_type<tc>, window_params = [{transform_indices = @transform_0, window_bounds = array<i64: 16, 527>}, {pipeline_mode = #tpu.pipeline_mode<synchronous>, transform_indices = @transform_1, window_bounds = array<i64: 527, 128>}, {pipeline_mode = #tpu.pipeline_mode<synchronous>, transform_indices = @transform_2, window_bounds = array<i64: 1, 128>}, {transform_indices = @transform_3, window_bounds = array<i64: 16, 128>}]} {
    %c0 = arith.constant 0 : index
    %c0_0 = arith.constant 0 : index
    %0 = vector.load %arg1[%c0, %c0_0] : memref<16x527xbf16, #tpu.memory_space<vmem>>, vector<16x527xbf16>
    %c0_1 = arith.constant 0 : index
    %c0_2 = arith.constant 0 : index
    %1 = vector.load %arg2[%c0_1, %c0_2] : memref<527x128xbf16, #tpu.memory_space<vmem>>, vector<527x128xbf16>
    %cst = arith.constant dense<0.000000e+00> : vector<16x128xf32>
    %2 = tpu.matmul %0, %1, %cst {dimension_numbers = #tpu.dot_dimension_numbers<[1], [0], [0], [1], [0, 0, 1, 1], [], []>} : vector<16x527xbf16>, vector<527x128xbf16>, vector<16x128xf32> -> vector<16x128xf32>
    %c0_3 = arith.constant 0 : index
    %c0_4 = arith.constant 0 : index
    %3 = vector.load %arg3[%c0_3, %c0_4] : memref<1x128xf32, #tpu.memory_space<vmem>>, vector<1x128xf32>
    %4 = vector.broadcast %3 : vector<1x128xf32> to vector<16x128xf32>
    %5 = arith.addf %2, %4 : vector<16x128xf32>
    %6 = arith.negf %5 : vector<16x128xf32>
    %7 = math.exp %6 : vector<16x128xf32>
    %cst_5 = arith.constant 1.000000e+00 : f32
    %8 = vector.broadcast %cst_5 : f32 to vector<16x128xf32>
    %9 = arith.addf %8, %7 : vector<16x128xf32>
    %10 = arith.divf %8, %9 : vector<16x128xf32>
    %11 = arith.truncf %10 : vector<16x128xf32> to vector<16x128xbf16>
    %c0_6 = arith.constant 0 : index
    %c0_7 = arith.constant 0 : index
    %12 = vector.load %arg4[%c0_6, %c0_7] : memref<16x128xbf16, #tpu.memory_space<vmem>>, vector<16x128xbf16>
    tpu.vector_store %arg4[%c0_6, %c0_7], %11 {strides = array<i32>} : memref<16x128xbf16, #tpu.memory_space<vmem>>, vector<16x128xbf16>,
    return
  }
  func.func @transform_0(%arg0: i32) -> (i32, i32) {
    %c0_i32 = arith.constant 0 : i32
    %c0_i32_0 = arith.constant 0 : i32
    return %arg0, %c0_i32 : i32, i32
  }
  func.func @transform_1(%arg0: i32) -> (i32, i32) {
    %c0_i32 = arith.constant 0 : i32
    %c0_i32_0 = arith.constant 0 : i32
    %c0_i32_1 = arith.constant 0 : i32
    return %c0_i32, %c0_i32_0 : i32, i32
  }
  func.func @transform_2(%arg0: i32) -> (i32, i32) {
    %c0_i32 = arith.constant 0 : i32
    %c0_i32_0 = arith.constant 0 : i32
    %c0_i32_1 = arith.constant 0 : i32
    return %c0_i32, %c0_i32_0 : i32, i32
  }
  func.func @transform_3(%arg0: i32) -> (i32, i32) {
    %c0_i32 = arith.constant 0 : i32
    %c0_i32_0 = arith.constant 0 : i32
    return %arg0, %c0_i32 : i32, i32
  }
}

</mosaic_0001>

<bundles_post_ra>
// kernel: tpu_custom_call.1
= control target key start
LH: loop header
LB: loop body
LE: loop exit
PB: predicated region body
PF: predicated region fallthrough
CT: control target
= control target key end

     0   :  { %8 = vsyncpa [#allocation3], 0  ;;  %s1440_s0 = inlined_call_operand.hbm [shape: bf16[24,527], index: 0, kind: input, shape index: {}]   ;;  %s1441_s1 = inlined_call_operand.hbm [shape: bf16[527,128], index: 1, kind: input, shape index: {}]   ;;  %s1442_s2 = inlined_call_operand.vmem [shape: f32[1,128], index: 2, kind: input, shape index: {}]   ;;  %s1443_s3 = inlined_call_operand.hbm [shape: bf16[24,128], index: 3, kind: output, shape index: {}]  }
   0x1   :  { %10 = vsyncpa [#allocation3 + $0x1], 0 }
   0x2   :  { %11 = vsyncpa [#allocation6], 0 }
   0x3   :  { %12 = vsyncpa [#allocation4], 0 }
   0x4   :  { %14 = vsyncpa [#allocation4 + $0x1], 0  ;;  %s1229_s12 = smov 0   ;;  %s1231_s13 = smov 0  }
   0x5   :  { %s1233_s14 = smov 0   ;;  %s1235_s15 = smov 0  }
   0x6 LB: > { %s1250_s16 = sadd.s32 4294967295, %s1197_s15   ;;  %s756_s17 = sadd.s32 4294967294, %s1197_s15   ;;  %s1197_s15 = sphi %s1235_s15, %s1460_s15   ;;  %s1193_s14 = sphi %s1233_s14, %s1459_s14   ;;  %s1189_s13 = sphi %s1231_s13, %s1458_s13   ;;  %s1185_s12 = sphi %s1229_s12, %s1457_s12  }
   0x7   : > { %s1254_s18 = sadd.s32 1, %s1197_s15   ;;  %s27_s19 = sadd.s32 1, %s1193_s14 }
   0x8   : > { %s24_s20 = ssub.s32 %s1197_s15, %s1254_s18  ;;  %p34_p0 = scmp.ne.s32.totalorder %s1193_s14, %s1189_s13 }
   0x9   : > { %p25_p1 = scmp.eq.s32.totalorder %s24_s20, 0  ;;  %p35_p2 = scmp.eq.s32.totalorder %s1197_s15, 0 }
   0xa   : > { %p40_p3 = scmp.ne.s32.totalorder %s1189_s13, %s1185_s12  ;;  %p1445_p4 = scmp.eq.s32.totalorder %s1250_s16, 0 }
   0xb   : > { %s1266_s21 = scalar_select %p25_p1, %s1193_s14, %s27_s19  }
   0xc   : > { %p1268_p5 = por %p35_p2, %p34_p0  ;;  %p1274_p6 = por %p1445_p4, %p40_p3 }
   0xd   : > { %p106_p7 = scmp.eq.s32.totalorder %s1250_s16, 1  ;;  %p112_p8 = scmp.eq.s32.totalorder %s756_s17, 1 }
   0xe   : > { %p757_p9 = scmp.ge.s32.totalorder %s1197_s15, 1  ;;  %p119_p10 = scmp.lt.s32.totalorder %s1197_s15, 3 }
   0xf   : > { %p1281_p11 = por %p106_p7, %p34_p0  ;;  %p1285_p12 = por %p112_p8, %p40_p3 }
  0x10   : > { %p1289_p13 = pnand %p757_p9, %p119_p10  ;;  %s130_s29 = sshll.u32 %s1441_s1, 4  ;;  %s131_s29 = int_to_ptr.hbm [resolvable:$true] %s130_s29 }
  0x11   : > { %s1449_s25 = scalar_select %p1285_p12, 1, 0 }
  0x12   : > { %p987_p1 = pneg %p1289_p13  ;;  %s1199_s30 = smov [#allocation5]  }
  0x13   : > { %s132_s4 = sshll.u32 %s1199_s30, 4  ;;  %s1200_s5 = smov 64   ;;  %s133_s4 = int_to_ptr.vmem [resolvable:$true] %s132_s4 }
  0x14   : > { %p988_p0 = pnand %p987_p1, %p1445_p4  ;;  %s1201_s6 = smov 4  }
  0x15   : > { %p1444_p2 = scmp.ge.s32.totalorder %s1197_s15, 2 }
  0x16   : > { %990 = dma.hbm_to_vmem [thread:$0]  (!%p988_p0), %s131_s29, 4224, %s133_s4, [#allocation6], %s1200_s5, %s1200_s5, %s1201_s6  }
  0x17   : > { %145 = sbr.rel (%p1444_p2) target bundleno = 69 (0x45), region = 24 }
  0x1c   : > { %148 = sbr.rel (!%p1268_p5) target bundleno = 69 (0x45), region = 28  ;;  %s149_s7 = sand.u32 (%p1268_p5), 1, %s1193_s14  }
  0x1d   : > { %s760_s8 = sshll.u32 (%p1268_p5), %s1197_s15, 1  ;;  %s978_s9 = smul.u32 (%p1268_p5), 40, %s149_s7 }
  0x1e   : > { %s155_s10 = ssub.s32 (%p1268_p5), 3, %s760_s8  ;;  %s1307_s20 = scalar_lea.sflag (%p1268_p5), [#allocation3], %s149_s7 }
  0x1f   : > { %p156_p3 = scmp.lt.s32.totalorder (%p1268_p5), %s155_s10, 2  ;;  %s153_s27 = scalar_lea.vmem (%p1268_p5), [#allocation2], %s978_s9 }
  0x21   : > { %s1462_s10 = smov (!%p156_p3, %s155_s10), 2 }
  0x22   : > { %s762_s11 = smul.u32 20, %s1462_s10 }
  0x24   : > { %s160_s17 = ssub.s32 40, %s762_s11 }
  0x25   : > { %s161_s19 = sshll.u32 %s160_s17, 4 }
  0x26   : > { %162 = vsyncadd %s1307_s20, %s161_s19  ;;  %p1310_p7 = scmp.ne.s32.totalorder %s762_s11, 0  ;;  %s979_s28 = smul.u32 40, %s1197_s15 }
  0x27   : > { %s1315_s29 = sshll.u32 %s153_s27, 4  ;;  %s1317_s30 = smul.u32 320, %s1462_s10  ;;  %s171_s29 = int_to_ptr.vmem [resolvable:$true] %s1315_s29 }
  0x28   : > { %s166_s6 = scalar_lea.hbm %s1440_s0, %s979_s28  ;;  %s1088_s28 = scalar_lea.hbm %s1440_s0, 60 }
  0x29   : > { %s168_s7 = sshll.u32 %s166_s6, 4  ;;  %s1079_s9 = sshrl.u32 %s1317_s30, 4  ;;  %s1323_s7 = int_to_ptr.hbm [resolvable:$true] %s168_s7 }
  0x2a   : > { %s1077_s8 = sshra.s32 %s1323_s7, 4  ;;  %s1115_s11 = sshll.u32 %s1079_s9, 4  ;;  %s1078_s8 = int_to_ptr.hbm [resolvable:$true] %s1077_s8 }
  0x2b   : > { %p1081_p5 = scmp.ne.s32.totalorder %s1115_s11, %s1317_s30  ;;  %s1082_s17 = sadd.s32 1, %s1079_s9 }
  0x2c   : > { %p1089_p1 = scmp.lt.s32.totalorder %s1078_s8, %s1440_s0 }
  0x2d   : > { %s1464_s17 = smov (!%p1081_p5, %s1082_s17), %s1079_s9 }
  0x2e   : > { %s1084_s10 = scalar_lea.hbm %s1078_s8, %s1464_s17 }
  0x2f   : > { %p1085_p8 = scmp.ne.s32.totalorder %s1078_s8, %s1084_s10  ;;  %p1090_p0 = scmp.lt.s32.totalorder %s1088_s28, %s1084_s10 }
  0x31   : > { %p1086_p9 = pnand %p1085_p8, %p1310_p7  ;;  %p1091_p3 = por %p1090_p0, %p1089_p1 }
  0x33   : > { %p1087_p10 = pneg %p1086_p9 }
  0x35   : > { %p1092_p2 = pnand %p1091_p3, %p1087_p10 }
  0x37   : > { %1095 = shalt.err (!%p1092_p2)
}
  0x38   : > { %s1096_s6 = sshra.s32 %s171_s29, 4  ;;  %s1202_s11 = smov [#allocation2]   ;;  %s1097_s6 = int_to_ptr.vmem [resolvable:$true] %s1096_s6 }
  0x39   : > { %s1103_s9 = scalar_lea.vmem %s1097_s6, %s1464_s17  ;;  %s1107_s19 = scalar_lea.vmem %s1202_s11, 80 }
  0x3a   : > { %p1104_p5 = scmp.ne.s32.totalorder %s1097_s6, %s1103_s9  ;;  %p1109_p4 = scmp.lt.s32.totalorder %s1107_s19, %s1103_s9 }
  0x3c   : > { %p1105_p8 = pnand %p1104_p5, %p1310_p7 }
  0x3e   : > { %p1106_p9 = pneg %p1105_p8 }
  0x40   : > { %p1111_p12 = pnand %p1109_p4, %p1106_p9 }
  0x42   : > { %1114 = shalt.err (!%p1111_p12)
}
  0x43   : > { %s1203_s8 = smov 320   ;;  %s1204_s10 = smov 20  }
  0x44   : > { %176 = dma.hbm_to_vmem [thread:$0]  (%p1310_p7), %s1323_s7, %s1317_s30, %s171_s29, %s1307_s20, %s1203_s8, %s1203_s8, %s1204_s10  }
  0x45 PF: > { %182 = sbr.rel (%p1289_p13) target bundleno = 324 (0x144), region = 32  ;;  %s1350_s17 = sand.u32 (!%p1289_p13), 1, %s1189_s13  }
  0x46   : > { %s980_s27 = smul.u32 (!%p1289_p13), 40, %s1350_s17  ;;  %s185_s28 = scalar_lea.sflag (!%p1289_p13), [#allocation3], %s1350_s17 }
  0x48   : > { %s1354_s4 = scalar_lea.vmem (!%p1289_p13), [#allocation2], %s980_s27 }
  0x4a   : > { %1172 = dma.done.wait (%p1274_p6), %s185_s28, 640  }
  0x4b   : > { %1174 = vsyncadd (%p1274_p6), %s185_s28, 4294966656  ;;  %p1452_p4 = scmp.eq.s32.totalorder %s1250_s16, 0 }
  0x4d   : > { %1176 = dma.done.wait (%p1452_p4), [#allocation6], 4224   ;;  %p1453_p12 = pmov %p1452_p4 }
  0x4e   : > { %v946_v0 = vld [vmem:[#allocation5 + $0x38] sm:$0xff]  ;;  %v945_v4 = vld [vmem:[#allocation5 + $0x30] sm:$0xff]  ;;  %v944_v8 = vld [vmem:[#allocation5 + $0x28] sm:$0xff]  ;;  %vm531_vm0 = vcmask 1046528   ;;  %vm532_vm1 = vcmask 1047552   ;;  %v1205_v26 = vmov 65535  }
  0x4f   : > { %1178 = vsyncadd (%p1453_p12), [#allocation6], 4294963072  ;;  %v962_v1 = vld [vmem:[#allocation5 + $0xb8] sm:$0xff]  ;;  %538 = vmatpush.bf16.msra.mxu0 %v946_v0  ;;  %v961_v5 = vld [vmem:[#allocation5 + $0xb0] sm:$0xff]  ;;  %v533_v27 = vsel %vm531_vm0, 4294967295, %v1205_v26  ;;  %vm527_vm2 = vcmask 121856  }
  0x50   : > { %v970_v2 = vld [vmem:[#allocation5 + $0xf8] sm:$0xff]  ;;  %566 = vmatpush.bf16.msra.mxu2 %v962_v1  ;;  %v969_v6 = vld [vmem:[#allocation5 + $0xf0] sm:$0xff]  ;;  %v960_v9 = vld [vmem:[#allocation5 + $0xa8] sm:$0xff]  ;;  %v534_v37 = vsel %vm532_vm1, %v533_v27, 0  ;;  %s769_s20 = sshll.u32 %s1350_s17, 3  ;;  %s651_s29 = scalar_lea.sflag [#allocation4], %s1350_s17 }
  0x51   : > { %v954_v3 = vld [vmem:[#allocation5 + $0x78] sm:$0xff]  ;;  %580 = vmatpush.bf16.msra.mxu3 %v970_v2  ;;  %v953_v7 = vld [vmem:[#allocation5 + $0x70] sm:$0xff]  ;;  %v968_v10 = vld [vmem:[#allocation5 + $0xe8] sm:$0xff]  ;;  %s216_s22 = scalar_lea.vmem [#allocation7], %s769_s20  ;;  %s926_s30 = sshll.u32 (%p1281_p11), %s1250_s16, 1 }
  0x52   : > { %552 = vmatpush.bf16.msra.mxu1 %v954_v3  ;;  %v952_v11 = vld [vmem:[#allocation5 + $0x68] sm:$0xff]  ;;  %v943_v12 = vld [vmem:[#allocation5 + $0x20] sm:$0xff]  ;;  %v942_v16 = vld [vmem:[#allocation5 + $0x18] sm:$0xff]  ;;  %s659_s7 = ssub.s32 (%p1281_p11), 3, %s926_s30 }
  0x53   : > { %539 = vmatpush.bf16.msra.mxu0 %v945_v4  ;;  %v959_v13 = vld [vmem:[#allocation5 + $0xa0] sm:$0xff]  ;;  %v958_v17 = vld [vmem:[#allocation5 + $0x98] sm:$0xff]  ;;  %v941_v20 = vld [vmem:[#allocation5 + $0x10] sm:$0xff]  ;;  %p660_p6 = scmp.lt.s32.totalorder (%p1281_p11), %s659_s7, 2 }
  0x54   : > { %567 = vmatpush.bf16.msra.mxu2 %v961_v5  ;;  %v967_v14 = vld [vmem:[#allocation5 + $0xe0] sm:$0xff]  ;;  %v966_v18 = vld [vmem:[#allocation5 + $0xd8] sm:$0xff]  ;;  %v957_v21 = vld [vmem:[#allocation5 + $0x90] sm:$0xff] }
  0x55   : > { %581 = vmatpush.bf16.msra.mxu3 %v969_v6  ;;  %v951_v15 = vld [vmem:[#allocation5 + $0x60] sm:$0xff]  ;;  %v950_v19 = vld [vmem:[#allocation5 + $0x58] sm:$0xff]  ;;  %v965_v22 = vld [vmem:[#allocation5 + $0xd0] sm:$0xff] }
  0x56   : > { %553 = vmatpush.bf16.msra.mxu1 %v953_v7  ;;  %v949_v23 = vld [vmem:[#allocation5 + $0x50] sm:$0xff]  ;;  %v940_v24 = vld [vmem:[#allocation5 + $0x8] sm:$0xff]  ;;  %v939_v30 = vld [vmem:[#allocation5] sm:$0xff] }
  0x57   : > { %540 = vmatpush.bf16.msra.mxu0 %v944_v8  ;;  %v956_v25 = vld [vmem:[#allocation5 + $0x88] sm:$0xff]  ;;  %v955_v31 = vld [vmem:[#allocation5 + $0x80] sm:$0xff]  ;;  %v772_v35 = vld [vmem:[%s1354_s4] sm:$0xf] }
  0x58   : > { %568 = vmatpush.bf16.msra.mxu2 %v960_v9  ;;  %v964_v28 = vld [vmem:[#allocation5 + $0xc8] sm:$0xff]  ;;  %v971_v32 = vld [vmem:[#allocation5 + $0x100] sm:$0xff]  ;;  %v782_v41 = vld [vmem:[%s1354_s4 + $0x1c] sm:$0xf0] }
  0x59   : > { %582 = vmatpush.bf16.msra.mxu3 %v968_v10  ;;  %v948_v29 = vld [vmem:[#allocation5 + $0x48] sm:$0xff]  ;;  %v963_v33 = vld [vmem:[#allocation5 + $0xc0] sm:$0xff]  ;;  %v934_v42 = vld [vmem:[%s1354_s4 + $0x4] sm:$0xf]  ;;  %v536_v44 = vand.u32 %v971_v32, %v534_v37 }
  0x5a   : > { %554 = vmatpush.bf16.msra.mxu1 %v952_v11  ;;  %v947_v34 = vld [vmem:[#allocation5 + $0x40] sm:$0xff]  ;;  %v937_v39 = vld [vmem:[%s1354_s4 + $0x18] sm:$0xf0]  ;;  %v774_v43 = vld [vmem:[%s1354_s4 + $0x14] sm:$0xf0] }
  0x5b   : > { %541 = vmatpush.bf16.msra.mxu0 %v943_v12  ;;  %v936_v36 = vld [vmem:[%s1354_s4 + $0x10] sm:$0xf0]  ;;  %v780_v38 = vld [vmem:[%s1354_s4 + $0x8] sm:$0xf]  ;;  %v935_v40 = vld [vmem:[%s1354_s4 + $0xc] sm:$0xf]  ;;  %v777_v48 = vor.u32 %v934_v42, %v774_v43 }
  0x5c   : > { %569 = vmatpush.bf16.msra.mxu2 %v959_v13  ;;  %v773_v45 = vor.u32 %v936_v36, %v772_v35  ;;  %v781_v46 = vor.u32 %v937_v39, %v780_v38  ;;  %v785_v47 = vor.u32 %v935_v40, %v782_v41  ;;  %v788_v49 = vld [vmem:[%s1354_s4 + $0x10] sm:$0xf]  ;;  %v938_v50 = vld [vmem:[%s1354_s4 + $0x20] sm:$0xf0]  ;;  %v1038_v53 = vld [vmem:[%s1442_s2] ss:$0 sm:$0xff] }
  0x5d   : > { %583 = vmatpush.bf16.msra.mxu3 %v967_v14  ;;  %v789_v51 = vor.u32 %v938_v50, %v788_v49 }
  0x5e   : > { %555 = vmatpush.bf16.msra.mxu1 %v951_v15 }
  0x5f   : > { %542 = vmatpush.bf16.msra.mxu0 %v942_v16 }
  0x60   : > { %570 = vmatpush.bf16.msra.mxu2 %v958_v17 }
  0x61   : > { %584 = vmatpush.bf16.msra.mxu3 %v966_v18 }
  0x62   : > { %556 = vmatpush.bf16.msra.mxu1 %v950_v19 }
  0x63   : > { %543 = vmatpush.bf16.msra.mxu0 %v941_v20 }
  0x64   : > { %571 = vmatpush.bf16.msra.mxu2 %v957_v21 }
  0x65   : > { %585 = vmatpush.bf16.msra.mxu3 %v965_v22 }
  0x66   : > { %557 = vmatpush.bf16.msra.mxu1 %v949_v23 }
  0x67   : > { %544 = vmatpush.bf16.msra.mxu0 %v940_v24 }
  0x68   : > { %572 = vmatpush.bf16.msra.mxu2 %v956_v25 }
  0x69   : > { %586 = vmatpush.bf16.msra.mxu3 %v964_v28 }
  0x6a   : > { %558 = vmatpush.bf16.msra.mxu1 %v948_v29 }
  0x6b   : > { %545 = vmatpush.bf16.msra.mxu0 %v939_v30 }
  0x6c   : > { %573 = vmatpush.bf16.msra.mxu2 %v955_v31 }
  0x6d   : > { %587 = vmatpush.bf16.msra.mxu3 %v963_v33 }
  0x6e   : > { %559 = vmatpush.bf16.msra.mxu1 %v947_v34  ;;  %546 = vmatmul.bf16.vlgmr.msra.gmra.mxu0 %v773_v45 }
  0x6f   : > { %601 = vmatpush.bf16.msrb.mxu0 %v536_v44  ;;  %574 = vmatmul.bf16.vlgmr.msra.gmra.mxu2 %v781_v46 }
  0x70   : > { %588 = vmatmul.bf16.vlgmr.msra.gmra.mxu3 %v785_v47 }
  0x71   : > { %560 = vmatmul.bf16.vlgmr.msra.gmra.mxu1 %v777_v48 }
  0x7e   : > { %922 = vmatmul.msk.bf16.vlgmr.msrb.gmra.mxu0 %vm527_vm2, %v789_v51 }
  0xeb   : > { %v547_v52 = vpop.f32.mrf.mxu0 }
  0xec   : > { %v548_v55 = vadd.f32 %v1038_v53, %v547_v52 }
  0xee   : > { %v561_v54 = vpop.f32.mrf.mxu1 }
  0xef   : > { %v562_v58 = vadd.f32 %v561_v54, %v548_v55 }
  0xf2   : > { %v575_v56 = vpop.f32.mrf.mxu2 }
  0xf3   : > { %v549_v57 = vpop.f32.mrf.mxu0  ;;  %v576_v59 = vadd.f32 %v575_v56, %v562_v58  ;;  %v589_v60 = vpop.f32.mrf.mxu3 }
  0xf4   : > { %v550_v61 = vadd.f32 %v1038_v53, %v549_v57 }
  0xf5   : > { %v590_v63 = vadd.f32 %v589_v60, %v576_v59 }
  0xf6   : > { %v563_v62 = vpop.f32.mrf.mxu1 }
  0xf7   : > { %v564_v2 = vadd.f32 %v563_v62, %v550_v61 }
  0xfa   : > { %v577_v0 = vpop.f32.mrf.mxu2 }
  0xfb   : > { %v603_v1 = vpop.f32.mrf.mxu0  ;;  %v578_v4 = vadd.f32 %v577_v0, %v564_v2  ;;  %v591_v6 = vpop.f32.mrf.mxu3 }
  0xfc   : > { %v604_v3 = vadd.f32 %v603_v1, %v590_v63 }
  0xfd   : > { %v592_v7 = vadd.f32 %v591_v6, %v578_v4 }
  0xfe   : > { %v923_v5 = vmul.f32 -1.442695, %v604_v3 }
 0x100   : > { %1039 = vpow2.f32 %v923_v5 }
 0x103   : > { %v605_v8 = vpop.f32.mrf.mxu0 }
 0x104   : > { %v606_v9 = vadd.f32 %v605_v8, %v592_v7 }
 0x106   : > { %v1040_v10 = vpop.eup %1039  ;;  %v924_v11 = vmul.f32 -1.442695, %v606_v9 }
 0x107   : > { %v614_v12 = vadd.f32 1.0, %v1040_v10 }
 0x108   : > { %1041 = vpow2.f32 %v924_v11 }
 0x109   : > { %1043 = vrcp.f32 %v614_v12  ;;  %vm621_vm4 = vweird.f32 %v614_v12  ;;  %v627_v23 = vand.u32 2147483648, %v614_v12  ;;  %v625_v25 = vand.u32 2147483647, %v614_v12 }
 0x10b   : > { %v628_v30 = vor.u32 1.1754944e-38, %v627_v23  ;;  %vm626_vm9 = vcmp.eq.f32.partialorder %v625_v25, 8.507059e+37 }
 0x10e   : > { %v1042_v13 = vpop.eup %1041 }
 0x10f   : > { %v1044_v14 = vpop.eup %1043  ;;  %v615_v15 = vadd.f32 1.0, %v1042_v13 }
 0x110   : > { %v617_v16 = vmul.f32 %v1044_v14, %v614_v12  ;;  %vm622_vm3 = vweird.f32 %v1044_v14 }
 0x111   : > { %1045 = vrcp.f32 %v615_v15  ;;  %v642_v24 = vand.u32 2147483648, %v615_v15  ;;  %v640_v27 = vand.u32 2147483647, %v615_v15  ;;  %vm623_vm6 = vmor %vm621_vm4, %vm622_vm3  ;;  %vm636_vm7 = vweird.f32 %v615_v15 }
 0x112   : > { %v618_v17 = vsub.f32 1.0, %v617_v16 }
 0x113   : > { %v643_v31 = vor.u32 1.1754944e-38, %v642_v24  ;;  %vm641_vm10 = vcmp.eq.f32.partialorder %v640_v27, 8.507059e+37 }
 0x114   : > { %v619_v18 = vmul.f32 %v1044_v14, %v618_v17 }
 0x116   : > { %v620_v21 = vadd.f32 %v1044_v14, %v619_v18 }
 0x117   : > { %v1046_v19 = vpop.eup %1045 }
 0x118   : > { %v632_v20 = vmul.f32 %v1046_v19, %v615_v15  ;;  %vm637_vm5 = vweird.f32 %v1046_v19  ;;  %v624_v28 = vsel %vm623_vm6, %v1044_v14, %v620_v21 }
 0x119   : > { %vm638_vm8 = vmor %vm636_vm7, %vm637_vm5  ;;  %v629_v33 = vsel %vm626_vm9, %v628_v30, %v624_v28 }
 0x11a   : > { %v633_v22 = vsub.f32 1.0, %v632_v20 }
 0x11c   : > { %v634_v26 = vmul.f32 %v1046_v19, %v633_v22 }
 0x11e   : > { %v635_v29 = vadd.f32 %v1046_v19, %v634_v26 }
 0x120   : > { %v639_v32 = vsel %vm638_vm8, %v1046_v19, %v635_v29  ;;  %657 = sbr.rel (!%p1281_p11) target bundleno = 324 (0x144), region = 44 }
 0x121   : > { %v644_v34 = vsel %vm641_vm10, %v643_v31, %v639_v32 }
 0x122   : > { %v976_v35 = vpack.c.bf16 %v644_v34, %v629_v33 }
 0x124   : > { %977 = vst [vmem:[%s216_s22] sm:$0xff] %v976_v35  }
 0x125   : > { %s1466_s7 = smov (!%p660_p6, %s659_s7), 2 }
 0x126   : > { %s927_s5 = sshll.u32 %s1466_s7, 2 }
 0x127   : > { %s663_s6 = ssub.s32 8, %s927_s5 }
 0x128   : > { %s664_s9 = sshll.u32 %s663_s6, 4 }
 0x129   : > { %665 = vsyncadd %s651_s29, %s664_s9  ;;  %p1387_p13 = scmp.ne.s32.totalorder %s927_s5, 0  ;;  %s972_s24 = sshll.u32 %s1250_s16, 3 }
 0x12a   : > { %s668_s10 = scalar_lea.hbm %s1443_s3, %s972_s24  ;;  %s670_s27 = sshll.u32 %s216_s22, 4  ;;  %s1395_s27 = int_to_ptr.vmem [resolvable:$true] %s670_s27 }
 0x12b   : > { %s672_s28 = sshll.u32 %s668_s10, 4  ;;  %s931_s4 = sshll.u32 %s1466_s7, 6  ;;  %s1397_s28 = int_to_ptr.hbm [resolvable:$true] %s672_s28 }
 0x12c   : > { %s1116_s23 = sshra.s32 %s1395_s27, 4  ;;  %s1118_s26 = sshrl.u32 %s931_s4, 4  ;;  %s1117_s23 = int_to_ptr.vmem [resolvable:$true] %s1116_s23 }
 0x12d   : > { %s1123_s20 = scalar_lea.vmem %s1117_s23, %s1118_s26  ;;  %s1206_s16 = smov [#allocation7]  }
 0x12e   : > { %p1124_p11 = scmp.ne.s32.totalorder %s1117_s23, %s1123_s20  ;;  %s1127_s30 = scalar_lea.vmem %s1206_s16, 16 }
 0x12f   : > { %p1129_p10 = scmp.lt.s32.totalorder %s1127_s30, %s1123_s20 }
 0x130   : > { %p1125_p2 = pnand %p1124_p11, %p1387_p13 }
 0x132   : > { %p1126_p7 = pneg %p1125_p2 }
 0x134   : > { %p1131_p1 = pnand %p1129_p10, %p1126_p7 }
 0x136   : > { %1134 = shalt.err (!%p1131_p1)
}
 0x137   : > { %s1135_s22 = sshra.s32 %s1397_s28, 4  ;;  %s1146_s24 = scalar_lea.hbm %s1443_s3, 12  ;;  %s1136_s22 = int_to_ptr.hbm [resolvable:$true] %s1135_s22 }
 0x138   : > { %s1142_s5 = scalar_lea.hbm %s1136_s22, %s1118_s26  ;;  %p1147_p8 = scmp.lt.s32.totalorder %s1136_s22, %s1443_s3 }
 0x139   : > { %p1143_p0 = scmp.ne.s32.totalorder %s1136_s22, %s1142_s5  ;;  %p1148_p9 = scmp.lt.s32.totalorder %s1146_s24, %s1142_s5 }
 0x13b   : > { %p1144_p3 = pnand %p1143_p0, %p1387_p13  ;;  %p1149_p4 = por %p1148_p9, %p1147_p8 }
 0x13d   : > { %p1145_p5 = pneg %p1144_p3 }
 0x13f   : > { %p1150_p12 = pnand %p1149_p4, %p1145_p5 }
 0x141   : > { %1153 = shalt.err (!%p1150_p12)
}
 0x142   : > { %s1207_s10 = smov 64   ;;  %s1208_s23 = smov 4  }
 0x143   : > { %678 = dma.vmem_to_hbm [thread:$0]  (%p1387_p13), %s1395_s27, %s931_s4, %s1397_s28, %s651_s29, %s1207_s10, %s1207_s10, %s1208_s23  }
 0x144 PF: > { %s687_s26 = sand.u32 1, %s1185_s12   ;;  %p1455_p6 = scmp.ne.s32.totalorder %s1449_s25, 0 }
 0x145   : > { %p1456_p11 = scmp.ge.s32.totalorder %s1197_s15, 2  ;;  %s688_s20 = scalar_lea.sflag [#allocation4], %s687_s26 }
 0x147   : > { %p992_p2 = pnand %p1456_p11, %p1455_p6 }
 0x149   : > { %p993_p7 = pneg %p992_p2 }
 0x14b   : > { %1180 = dma.done.wait (%p993_p7), %s688_s20, 128  }
 0x14c   : > { %1182 = vsyncadd (%p993_p7), %s688_s20, 4294967168  ;;  %p17_p10 = scmp.ge.s32.totalorder %s1254_s18, 4   ;;  %s1457_s12 = smov %s1189_s13 }
 0x14d   : > { %s1458_s13 = smov %s1193_s14  ;;  %s1459_s14 = smov %s1266_s21 }
 0x14e   : > { %s1460_s15 = smov %s1254_s18  ;;  %19 = sbr.rel (!%p17_p10) target bundleno = 6 (0x6), region = 81 }
 0x153   :  { %694 = vsyncpa [#allocation3], 1 }
 0x154   :  { %696 = vsyncpa [#allocation3 + $0x1], 1 }
 0x155   :  { %697 = vsyncpa [#allocation6], 1 }
 0x156   :  { %698 = vsyncpa [#allocation4], 1 }
 0x157   :  { %700 = vsyncpa [#allocation4 + $0x1], 1 }

</bundles_post_ra>
